<compile_context>
chip_gen: v7x
topology: tpu7x:2x2x1
jax: 0.10.0
libtpu: 0.0.40
codegen_flags: <defaults>
</compile_context>

<pallas_src>
import numpy as np
import jax
import jax.numpy as jnp
from jax import lax
from jax.experimental import pallas as pl
from jax.experimental.pallas import tpu as pltpu


_TWO_PI = np.float32(2.0 * np.pi)
_INV_TWO_PI = np.float32(1.0 / (2.0 * np.pi))


def _round_up(x, m):
    return ((x + m - 1) // m) * m


def _anti_wrap(x):
    # |x - round(x / 2pi) * 2pi|; round-half-to-even == torch.round.
    # Multiply by a precomputed 1/(2pi) instead of dividing (stays on VALU).
    return jnp.abs(x - jnp.round(x * _INV_TWO_PI) * _TWO_PI)


# ---------------------------------------------------------------------------
# Kernel factory.  All sizes / the freq<->lane assignment are STATIC per scale
# (one pallas_call per scale), so no scalar prefetch is needed.
#
#   pr_ref, pg_ref : VMEM (bt*d0, d1)  -- bt batch elements stacked on sublanes,
#                    each zero-padded to (d0, d1) with >= 1 pad row and lane.
#   out_ref        : VMEM (8, 128) lane-dense tile; [0, 0:3] = (ip, gd, iaf) sums.
# ---------------------------------------------------------------------------
def _make_phase_sum_kernel(bt, d0, d1, sub_true, lane_true, gd_is_lane):
    def kernel(pr_ref, pg_ref, out_ref):
        d = pr_ref[...] - pg_ref[...]                      # (bt*d0, d1) phase diff

        # Instantaneous phase: pad elements are zero in BOTH phases -> d == 0
        # -> anti_wrap == 0, so no mask at all.
        ip_sum = jnp.sum(_anti_wrap(d))

        # Lane-direction first difference on the whole fused tile (batch sits on
        # sublanes, so lanes never mix batch elements).  The wrap at lane 0
        # pulls the guaranteed-zero pad lane d1-1, so anti_wrap(d_l - d)[.,0]
        # already equals the reference boundary column anti_wrap(d[.,0]); only
        # the pad seam (lane >= lane_true) must be excluded.
        lane_idx = lax.broadcasted_iota(jnp.int32, (bt * d0, d1), 1)
        d_l = pltpu.roll(d, shift=1, axis=1)
        lane_sum = jnp.sum(jnp.where(lane_idx < lane_true,
                                     _anti_wrap(d_l - d), 0.0))

        # Sublane-direction first difference, per batch element (static unroll;
        # slices are 8-row aligned views, no relayout).  Each element's row 0
        # wraps onto its own zero pad row d0-1 -> boundary row for free; only
        # the pad seam row (row >= sub_true) is masked out.
        row_valid = lax.broadcasted_iota(jnp.int32, (d0, d1), 0) < sub_true
        sub_sum = jnp.float32(0.0)
        for k in range(bt):
            dk = d[k * d0:(k + 1) * d0, :]
            dk_s = pltpu.roll(dk, shift=1, axis=0)
            sub_sum = sub_sum + jnp.sum(
                jnp.where(row_valid, _anti_wrap(dk_s - dk), 0.0))

        gd_sum, iaf_sum = (lane_sum, sub_sum) if gd_is_lane else (sub_sum, lane_sum)

        # Lane-dense (8, 128) output tile (single vreg; cost is noise now that
        # grid steps are few and blocks are large).
        lane = lax.broadcasted_iota(jnp.int32, (8, 128), 1)
        sub = lax.broadcasted_iota(jnp.int32, (8, 128), 0)
        tri = jnp.where(lane == 0, ip_sum,
              jnp.where(lane == 1, gd_sum,
              jnp.where(lane == 2, iaf_sum, 0.0)))
        out_ref[...] = jnp.where(sub == 0, tri, 0.0)

    return kernel


def _phase_loss_sums_one_scale(phase_r, phase_g):
    """phase_r/phase_g: (B, T, F) float32 -> (3,) raw (ip, gd, iaf) sums."""
    b, t, f = phase_r.shape

    # Per-scale layout choice: lanes pad to a multiple of 128 (+1), sublanes
    # only to 8 (+1) -- put whichever axis wastes less padding on lanes.
    cost_f_lanes = _round_up(t + 1, 8) * _round_up(f + 1, 128)
    cost_t_lanes = _round_up(f + 1, 8) * _round_up(t + 1, 128)
    if cost_f_lanes <= cost_t_lanes:
        sub_true, lane_true, gd_is_lane = t, f, True          # (B, T, F)
    else:
        phase_r = jnp.swapaxes(phase_r, 1, 2)                 # (B, F, T)
        phase_g = jnp.swapaxes(phase_g, 1, 2)
        sub_true, lane_true, gd_is_lane = f, t, False

    # >= 1 zero pad row AND lane per element: load-bearing for the roll-wrap /
    # fused-boundary trick (do not drop the +1).
    d0 = _round_up(sub_true + 1, 8)
    d1 = _round_up(lane_true + 1, 128)

    # Batch tile: fold batch into the block (large DMAs) under a ~2 MiB/block
    # budget (2 inputs x 2 pipeline buffers + temporaries stay far below the
    # v7x scoped-VMEM default); cap the static sublane-diff unroll at 8.
    per_elem_bytes = d0 * d1 * 4
    bt = max(1, min(b, 8, (2 << 20) // per_elem_bytes))
    # Keep >= 2 parallel grid steps for v7x's two TensorCores when batch allows
    # and the split does not push blocks below ~1 MiB.
    if bt >= b and b >= 2 and (b // 2) * per_elem_bytes >= (1 << 20):
        bt = -(-b // 2)
    nb = -(-b // bt)
    b_pad = nb * bt

    def prep(p):
        # Zero-pad (pads contribute exactly zero to all three sums) and fuse
        # batch onto sublanes.  XLA fuses the transpose/pad/reshape into one copy.
        p = jnp.pad(p, ((0, b_pad - b), (0, d0 - p.shape[1]), (0, d1 - p.shape[2])))
        return p.reshape(b_pad * d0, d1)

    pr2, pg2 = prep(phase_r), prep(phase_g)
    rows = bt * d0
    block_bytes = rows * d1 * 4
    vmem_limit = int(min(64 << 20, max(16 << 20, 12 * block_bytes)))

    # TODO(synk): very long audio (T*F per element >~ 1e6) additionally needs a
    # time-tile grid axis with a one-row halo for the sublane diff (v7x 64 MiB
    # VMEM); not needed at these sizes.
    # TODO(synk): optional bf16 phase loads (upcast in-kernel, f32 accumulate)
    # would ~halve HBM bytes on the bandwidth-bound v5e; kept f32 for accuracy.
    out = pl.pallas_call(
        _make_phase_sum_kernel(bt, d0, d1, sub_true, lane_true, gd_is_lane),
        out_shape=jax.ShapeDtypeStruct((nb, 8, 128), jnp.float32),
        grid=(nb,),
        in_specs=[pl.BlockSpec((rows, d1), lambda i: (i, 0)),
                  pl.BlockSpec((rows, d1), lambda i: (i, 0))],
        out_specs=pl.BlockSpec((None, 8, 128), lambda i: (i, 0, 0)),
        compiler_params=pltpu.CompilerParams(
            dimension_semantics=("parallel",),
            vmem_limit_bytes=vmem_limit),
    )(pr2, pg2)

    return jnp.sum(out[:, 0, :3], axis=0)       # (3,) raw sums over the batch


# ---------------------------------------------------------------------------
# Plain-JAX glue: torch.stft(center=True, reflect pad, rect window) + angle.
# TODO(synk): the FFT itself has no Pallas primitive; kept in plain JAX/XLA.
# ---------------------------------------------------------------------------
def _stft_phase(x, n_fft):
    """x: (B, L) float32 -> phase (B, T, F) float32, F = n_fft//2 + 1."""
    hop = n_fft // 4
    pad = n_fft // 2
    xp = jnp.pad(x, ((0, 0), (pad, pad)), mode="reflect")
    n_frames = x.shape[1] // hop + 1
    idx = jnp.arange(n_frames)[:, None] * hop + jnp.arange(n_fft)[None, :]
    frames = xp[:, idx]                         # (B, T, n_fft)
    spec = jnp.fft.rfft(frames, axis=-1)        # (B, T, F)
    return jnp.angle(spec).astype(jnp.float32)


def multiscale_phase_loss(output, target, chunk_sizes, out_dict=True):
    batch = output.shape[0]
    per_scale = []
    for n_fft in chunk_sizes:
        pr = _stft_phase(output, n_fft)
        pg = _stft_phase(target, n_fft)
        t_dim, f_dim = pr.shape[1], pr.shape[2]
        sums = _phase_loss_sums_one_scale(pr, pg)            # (3,) raw sums
        per_scale.append(sums / np.float32(batch * t_dim * f_dim))
    per_scale = jnp.stack(per_scale)                          # (S, 3) = (ip, gd, iaf)
    loss_per_element = jnp.mean(per_scale, axis=0)            # (3,) mean over scales
    loss = jnp.mean(loss_per_element)                         # reduction = torch.mean
    return {"MultiscalePhaseLoss": loss} if out_dict else loss


# ---------------------------------------------------------------------------
# Pure-JAX reference (matmul formulation, mirrors the PyTorch module) -- used
# only as an in-script correctness check.
# ---------------------------------------------------------------------------
def _phase_losses_reference(phase_r, phase_g):
    _, t_dim, f_dim = phase_r.shape             # phases are (B, T, F)
    ones_f = jnp.ones((f_dim, f_dim), jnp.float32)
    gd_mat = jnp.triu(ones_f, 1) - jnp.triu(ones_f, 2) - jnp.eye(f_dim, dtype=jnp.float32)
    ones_t = jnp.ones((t_dim, t_dim), jnp.float32)
    iaf_mat = jnp.triu(ones_t, 1) - jnp.triu(ones_t, 2) - jnp.eye(t_dim, dtype=jnp.float32)

    def aw(x):
        return jnp.abs(x - jnp.round(x / (2.0 * np.pi)) * (2.0 * np.pi))

    ip = jnp.mean(aw(phase_r - phase_g))
    gd = jnp.mean(aw(phase_r @ gd_mat - phase_g @ gd_mat))
    iaf_r = jnp.einsum("btf,ts->bsf", phase_r, iaf_mat)
    iaf_g = jnp.einsum("btf,ts->bsf", phase_g, iaf_mat)
    iaf = jnp.mean(aw(iaf_r - iaf_g))
    return jnp.stack([ip, gd, iaf])


def multiscale_phase_loss_reference(output, target, chunk_sizes):
    per_scale = [_phase_losses_reference(_stft_phase(output, n), _stft_phase(target, n))
                 for n in chunk_sizes]
    return jnp.mean(jnp.mean(jnp.stack(per_scale), axis=0))


if __name__ == "__main__":
    key = jax.random.PRNGKey(0)
    k1, k2 = jax.random.split(key)
    batch, seq_len = 2, 256
    chunk_sizes = (64, 128)   # n_fft per scale (small, consistent with seq_len)

    output = jax.random.normal(k1, (batch, seq_len), dtype=jnp.float32)
    target = jax.random.normal(k2, (batch, seq_len), dtype=jnp.float32)

    result = multiscale_phase_loss(output, target, chunk_sizes)
    loss = jax.block_until_ready(result["MultiscalePhaseLoss"])
    ref = jax.block_until_ready(
        multiscale_phase_loss_reference(output, target, chunk_sizes))

    assert jnp.isfinite(loss)
    assert abs(float(loss) - float(ref)) <= 2e-3 * max(1.0, abs(float(ref))), (
        f"kernel loss {float(loss)} vs reference {float(ref)}")
    print("KERNEL_OK")
</pallas_src>

<mosaic_0001>
module attributes {stable_mosaic.version = 11 : i64} {
  func.func @kernel(%arg0: i32, %arg1: memref<48x128xf32, #tpu.memory_space<vmem>>, %arg2: memref<48x128xf32, #tpu.memory_space<vmem>>, %arg3: memref<1x8x128xf32, #tpu.memory_space<vmem>>) attributes {dimension_semantics = [#tpu.dimension_semantics<parallel>], iteration_bounds = array<i64: 1>, scalar_prefetch = 0 : i64, scratch_operands = 0 : i64, tpu.core_type = #tpu.core_type<tc>, window_params = [{transform_indices = @transform_0, window_bounds = array<i64: 48, 128>}, {transform_indices = @transform_1, window_bounds = array<i64: 48, 128>}, {transform_indices = @transform_2, window_bounds = array<i64: 1, 8, 128>}]} {
    %c0 = arith.constant 0 : index
    %c0_0 = arith.constant 0 : index
    %0 = vector.load %arg1[%c0, %c0_0] : memref<48x128xf32, #tpu.memory_space<vmem>>, vector<48x128xf32>
    %c0_1 = arith.constant 0 : index
    %c0_2 = arith.constant 0 : index
    %1 = vector.load %arg2[%c0_1, %c0_2] : memref<48x128xf32, #tpu.memory_space<vmem>>, vector<48x128xf32>
    %2 = arith.subf %0, %1 : vector<48x128xf32>
    %cst = arith.constant 0.159154937 : f32
    %3 = vector.broadcast %cst : f32 to vector<48x128xf32>
    %4 = arith.mulf %2, %3 : vector<48x128xf32>
    %5 = math.roundeven %4 : vector<48x128xf32>
    %cst_3 = arith.constant 6.28318548 : f32
    %6 = vector.broadcast %cst_3 : f32 to vector<48x128xf32>
    %7 = arith.mulf %5, %6 : vector<48x128xf32>
    %8 = arith.subf %2, %7 : vector<48x128xf32>
    %9 = math.absf %8 : vector<48x128xf32>
    %10 = vector.shape_cast %9 : vector<48x128xf32> to vector<1x48x128xf32>
    %cst_4 = arith.constant dense<0.000000e+00> : vector<1xf32>
    %11 = vector.multi_reduction <add>, %10, %cst_4 [1, 2] : vector<1x48x128xf32> to vector<1xf32>
    %12 = vector.shape_cast %11 : vector<1xf32> to vector<1x1x1xf32>
    %13 = vector.extract %12[0, 0, 0] : f32 from vector<1x1x1xf32>
    %14 = tpu.iota {dimensions = array<i32: 1>} : vector<48x128xi32>
    %c1_i32 = arith.constant 1 : i32
    %15 = tpu.dynamic_rotate %2 by %c1_i32 dim 1 : vector<48x128xf32>, i32 -> vector<48x128xf32>
    %c33_i32 = arith.constant 33 : i32
    %16 = vector.broadcast %c33_i32 : i32 to vector<48x128xi32>
    %17 = arith.cmpi slt, %14, %16 : vector<48x128xi32>
    %18 = arith.subf %15, %2 : vector<48x128xf32>
    %cst_5 = arith.constant 0.159154937 : f32
    %19 = vector.broadcast %cst_5 : f32 to vector<48x128xf32>
    %20 = arith.mulf %18, %19 : vector<48x128xf32>
    %21 = math.roundeven %20 : vector<48x128xf32>
    %cst_6 = arith.constant 6.28318548 : f32
    %22 = vector.broadcast %cst_6 : f32 to vector<48x128xf32>
    %23 = arith.mulf %21, %22 : vector<48x128xf32>
    %24 = arith.subf %18, %23 : vector<48x128xf32>
    %25 = math.absf %24 : vector<48x128xf32>
    %cst_7 = arith.constant 0.000000e+00 : f32
    %26 = vector.broadcast %cst_7 : f32 to vector<48x128xf32>
    %27 = arith.select %17, %25, %26 : vector<48x128xi1>, vector<48x128xf32>
    %28 = vector.shape_cast %27 : vector<48x128xf32> to vector<1x48x128xf32>
    %cst_8 = arith.constant dense<0.000000e+00> : vector<1xf32>
    %29 = vector.multi_reduction <add>, %28, %cst_8 [1, 2] : vector<1x48x128xf32> to vector<1xf32>
    %30 = vector.shape_cast %29 : vector<1xf32> to vector<1x1x1xf32>
    %31 = vector.extract %30[0, 0, 0] : f32 from vector<1x1x1xf32>
    %32 = tpu.iota {dimensions = array<i32: 0>} : vector<24x128xi32>
    %c17_i32 = arith.constant 17 : i32
    %33 = vector.broadcast %c17_i32 : i32 to vector<24x128xi32>
    %34 = arith.cmpi slt, %32, %33 : vector<24x128xi32>
    %35 = vector.extract_strided_slice %2 {offsets = [0, 0], sizes = [24, 128], strides = [1, 1]} : vector<48x128xf32> to vector<24x128xf32>
    %c1_i32_9 = arith.constant 1 : i32
    %36 = tpu.dynamic_rotate %35 by %c1_i32_9 dim 0 : vector<24x128xf32>, i32 -> vector<24x128xf32>
    %37 = arith.subf %36, %35 : vector<24x128xf32>
    %cst_10 = arith.constant 0.159154937 : f32
    %38 = vector.broadcast %cst_10 : f32 to vector<24x128xf32>
    %39 = arith.mulf %37, %38 : vector<24x128xf32>
    %40 = math.roundeven %39 : vector<24x128xf32>
    %cst_11 = arith.constant 6.28318548 : f32
    %41 = vector.broadcast %cst_11 : f32 to vector<24x128xf32>
    %42 = arith.mulf %40, %41 : vector<24x128xf32>
    %43 = arith.subf %37, %42 : vector<24x128xf32>
    %44 = math.absf %43 : vector<24x128xf32>
    %cst_12 = arith.constant 0.000000e+00 : f32
    %45 = vector.broadcast %cst_12 : f32 to vector<24x128xf32>
    %46 = arith.select %34, %44, %45 : vector<24x128xi1>, vector<24x128xf32>
    %47 = vector.shape_cast %46 : vector<24x128xf32> to vector<1x24x128xf32>
    %cst_13 = arith.constant dense<0.000000e+00> : vector<1xf32>
    %48 = vector.multi_reduction <add>, %47, %cst_13 [1, 2] : vector<1x24x128xf32> to vector<1xf32>
    %49 = vector.shape_cast %48 : vector<1xf32> to vector<1x1x1xf32>
    %50 = vector.extract %49[0, 0, 0] : f32 from vector<1x1x1xf32>
    %cst_14 = arith.constant 0.000000e+00 : f32
    %51 = arith.addf %cst_14, %50 : f32
    %52 = vector.extract_strided_slice %2 {offsets = [24, 0], sizes = [24, 128], strides = [1, 1]} : vector<48x128xf32> to vector<24x128xf32>
    %c1_i32_15 = arith.constant 1 : i32
    %53 = tpu.dynamic_rotate %52 by %c1_i32_15 dim 0 : vector<24x128xf32>, i32 -> vector<24x128xf32>
    %54 = arith.subf %53, %52 : vector<24x128xf32>
    %cst_16 = arith.constant 0.159154937 : f32
    %55 = vector.broadcast %cst_16 : f32 to vector<24x128xf32>
    %56 = arith.mulf %54, %55 : vector<24x128xf32>
    %57 = math.roundeven %56 : vector<24x128xf32>
    %cst_17 = arith.constant 6.28318548 : f32
    %58 = vector.broadcast %cst_17 : f32 to vector<24x128xf32>
    %59 = arith.mulf %57, %58 : vector<24x128xf32>
    %60 = arith.subf %54, %59 : vector<24x128xf32>
    %61 = math.absf %60 : vector<24x128xf32>
    %cst_18 = arith.constant 0.000000e+00 : f32
    %62 = vector.broadcast %cst_18 : f32 to vector<24x128xf32>
    %63 = arith.select %34, %61, %62 : vector<24x128xi1>, vector<24x128xf32>
    %64 = vector.shape_cast %63 : vector<24x128xf32> to vector<1x24x128xf32>
    %cst_19 = arith.constant dense<0.000000e+00> : vector<1xf32>
    %65 = vector.multi_reduction <add>, %64, %cst_19 [1, 2] : vector<1x24x128xf32> to vector<1xf32>
    %66 = vector.shape_cast %65 : vector<1xf32> to vector<1x1x1xf32>
    %67 = vector.extract %66[0, 0, 0] : f32 from vector<1x1x1xf32>
    %68 = arith.addf %51, %67 : f32
    %69 = tpu.iota {dimensions = array<i32: 1>} : vector<8x128xi32>
    %70 = tpu.iota {dimensions = array<i32: 0>} : vector<8x128xi32>
    %c0_i32 = arith.constant 0 : i32
    %71 = vector.broadcast %c0_i32 : i32 to vector<8x128xi32>
    %72 = arith.cmpi eq, %69, %71 : vector<8x128xi32>
    %c1_i32_20 = arith.constant 1 : i32
    %73 = vector.broadcast %c1_i32_20 : i32 to vector<8x128xi32>
    %74 = arith.cmpi eq, %69, %73 : vector<8x128xi32>
    %c2_i32 = arith.constant 2 : i32
    %75 = vector.broadcast %c2_i32 : i32 to vector<8x128xi32>
    %76 = arith.cmpi eq, %69, %75 : vector<8x128xi32>
    %cst_21 = arith.constant 0.000000e+00 : f32
    %77 = vector.broadcast %68 : f32 to vector<8x128xf32>
    %78 = vector.broadcast %cst_21 : f32 to vector<8x128xf32>
    %79 = arith.select %76, %77, %78 : vector<8x128xi1>, vector<8x128xf32>
    %80 = vector.broadcast %31 : f32 to vector<8x128xf32>
    %81 = arith.select %74, %80, %79 : vector<8x128xi1>, vector<8x128xf32>
    %82 = vector.broadcast %13 : f32 to vector<8x128xf32>
    %83 = arith.select %72, %82, %81 : vector<8x128xi1>, vector<8x128xf32>
    %c0_i32_22 = arith.constant 0 : i32
    %84 = vector.broadcast %c0_i32_22 : i32 to vector<8x128xi32>
    %85 = arith.cmpi eq, %70, %84 : vector<8x128xi32>
    %cst_23 = arith.constant 0.000000e+00 : f32
    %86 = vector.broadcast %cst_23 : f32 to vector<8x128xf32>
    %87 = arith.select %85, %83, %86 : vector<8x128xi1>, vector<8x128xf32>
    %c0_24 = arith.constant 0 : index
    %c0_25 = arith.constant 0 : index
    %c0_26 = arith.constant 0 : index
    %88 = vector.load %arg3[%c0_24, %c0_25, %c0_26] : memref<1x8x128xf32, #tpu.memory_space<vmem>>, vector<1x8x128xf32>
    %89 = vector.shape_cast %88 : vector<1x8x128xf32> to vector<8x128xf32>
    %90 = vector.shape_cast %87 : vector<8x128xf32> to vector<1x8x128xf32>
    tpu.vector_store %arg3[%c0_24, %c0_25, %c0_26], %90 {strides = array<i32>} : memref<1x8x128xf32, #tpu.memory_space<vmem>>, vector<1x8x128xf32>,
    return
  }
  func.func @transform_0(%arg0: i32) -> (i32, i32) {
    %c0_i32 = arith.constant 0 : i32
    %c0_i32_0 = arith.constant 0 : i32
    return %arg0, %c0_i32 : i32, i32
  }
  func.func @transform_1(%arg0: i32) -> (i32, i32) {
    %c0_i32 = arith.constant 0 : i32
    %c0_i32_0 = arith.constant 0 : i32
    return %arg0, %c0_i32 : i32, i32
  }
  func.func @transform_2(%arg0: i32) -> (i32, i32, i32) {
    %c0_i32 = arith.constant 0 : i32
    %c0_i32_0 = arith.constant 0 : i32
    %c0_i32_1 = arith.constant 0 : i32
    return %arg0, %c0_i32, %c0_i32_0 : i32, i32, i32
  }
}

</mosaic_0001>

<bundles_post_ra>
// kernel: tpu_custom_call.1
= control target key start
LH: loop header
LB: loop body
LE: loop exit
PB: predicated region body
PF: predicated region fallthrough
CT: control target
= control target key end

     0   :  { %7 = vsyncpa [#allocation3], 0  ;;  %s533_s0 = inlined_call_operand.hbm [shape: f32[48,128], index: 0, kind: input, shape index: {}]   ;;  %s534_s1 = inlined_call_operand.hbm [shape: f32[48,128], index: 1, kind: input, shape index: {}]   ;;  %s535_s2 = inlined_call_operand.hbm [shape: f32[1,8,128], index: 2, kind: output, shape index: {}]  }
   0x1   :  { %8 = vsyncpa [#allocation6], 0 }
   0x2   :  { %9 = vsyncpa [#allocation4], 0  ;;  %s391_s9 = smov [#allocation2]   ;;  %s319_s13 = scalar_lea.hbm %s533_s0, 768 }
   0x3   :  { %s15_s10 = sshll.u32 %s391_s9, 4  ;;  %p320_p0 = scmp.ne.s32.totalorder %s533_s0, %s319_s13  ;;  %s16_s10 = int_to_ptr.vmem [resolvable:$true] %s15_s10 }
   0x4   :  { %p323_p1 = scmp.lt.u32.totalorder %s319_s13, %s533_s0 }
   0x6   :  { %p325_p2 = pnand %p323_p1, %p320_p0 }
   0x8   :  { %328 = shalt.err (!%p325_p2)
}
   0x9   :  { %s329_s18 = scalar_lea.vmem %s16_s10, 768  ;;  %p334_p4 = scmp.lt.s32.totalorder %s16_s10, %s16_s10 }
   0xa   :  { %p330_p3 = scmp.ne.s32.totalorder %s16_s10, %s329_s18  ;;  %p335_p5 = scmp.lt.s32.totalorder %s329_s18, %s329_s18 }
   0xc   :  { %p336_p6 = por %p335_p5, %p334_p4 }
   0xe   :  { %p337_p7 = pnand %p336_p6, %p330_p3 }
  0x10   :  { %340 = shalt.err (!%p337_p7)
}
  0x11   :  { %s392_s19 = smov 128   ;;  %s393_s20 = smov 8  }
  0x12   :  { %21 = dma.hbm_to_vmem [thread:$0]  %s533_s0, 768, %s16_s10, [#allocation3], %s392_s19, %s392_s19, %s393_s20  }
  0x13   :  { %s394_s23 = smov [#allocation5]   ;;  %s341_s27 = scalar_lea.hbm %s534_s1, 768 }
  0x14   :  { %s27_s24 = sshll.u32 %s394_s23, 4  ;;  %p342_p8 = scmp.ne.s32.totalorder %s534_s1, %s341_s27  ;;  %s28_s24 = int_to_ptr.vmem [resolvable:$true] %s27_s24 }
  0x15   :  { %p345_p9 = scmp.lt.u32.totalorder %s341_s27, %s534_s1 }
  0x17   :  { %p347_p10 = pnand %p345_p9, %p342_p8 }
  0x19   :  { %350 = shalt.err (!%p347_p10)
}
  0x1a   :  { %s351_s4 = scalar_lea.vmem %s28_s24, 768  ;;  %p356_p12 = scmp.lt.s32.totalorder %s28_s24, %s28_s24 }
  0x1b   :  { %p352_p11 = scmp.ne.s32.totalorder %s28_s24, %s351_s4  ;;  %p357_p13 = scmp.lt.s32.totalorder %s351_s4, %s351_s4 }
  0x1d   :  { %p358_p0 = por %p357_p13, %p356_p12 }
  0x1f   :  { %p359_p1 = pnand %p358_p0, %p352_p11 }
  0x21   :  { %362 = shalt.err (!%p359_p1)
}
  0x22   :  { %33 = dma.hbm_to_vmem [thread:$0]  %s534_s1, 768, %s28_s24, [#allocation6], %s392_s19, %s392_s19, %s393_s20  }
  0x23   :  { %385 = dma.done.wait [#allocation3], 768  }
  0x24   :  { %386 = vsyncadd [#allocation3], 4294966528 }
  0x25   :  { %387 = dma.done.wait [#allocation6], 768  }
  0x26   :  { %388 = vsyncadd [#allocation6], 4294966528  ;;  %v42_v0 = vld [vmem:[#allocation2 + $0x10] sm:$0xff]  ;;  %v48_v1 = vld [vmem:[#allocation5 + $0x10] sm:$0xff]  ;;  %v102_v3 = vlaneseq  ;;  %s395_s6 = smov 1   ;;  %s396_s11 = smov [#allocation7]  }
  0x27   :  { %v40_v2 = vld [vmem:[#allocation2] sm:$0xff]  ;;  %v436_v4 = vsub.f32 %v42_v0, %v48_v1  ;;  %v46_v5 = vld [vmem:[#allocation5] sm:$0xff]  ;;  %v43_v6 = vld [vmem:[#allocation2 + $0x18] sm:$0xff]  ;;  %s277_s12 = sshll.u32 %s396_s11, 4  ;;  %s278_s12 = int_to_ptr.vmem [resolvable:$true] %s277_s12 }
  0x28   :  { %v49_v7 = vld [vmem:[#allocation5 + $0x18] sm:$0xff]  ;;  %v438_v8 = vsub.f32 %v40_v2, %v46_v5  ;;  %v47_v10 = vld [vmem:[#allocation5 + $0x8] sm:$0xff]  ;;  %v448_v16 = vshrl.u32 %v102_v3, 7  ;;  %v44_v17 = vld [vmem:[#allocation2 + $0x20] sm:$0xff]  ;;  %s363_s13 = scalar_lea.vmem %s278_s12, 128  ;;  %p368_p3 = scmp.lt.s32.totalorder %s278_s12, %s278_s12 }
  0x29   :  { %v41_v9 = vld [vmem:[#allocation2 + $0x8] sm:$0xff]  ;;  %108 = vrot.lane.b32.xlu1 %v436_v4, %s395_s6  ;;  %v441_v11 = vsub.f32 %v43_v6, %v49_v7  ;;  %v51_v14 = vld [vmem:[#allocation5 + $0x28] sm:$0xff]  ;;  %v50_v18 = vld [vmem:[#allocation5 + $0x20] sm:$0xff]  ;;  %v60_v20 = vmul.f32 0.15915494, %v436_v4  ;;  %v182_v27 = vrot.slane %v436_v4, 7  ;;  %p364_p2 = scmp.ne.s32.totalorder %s278_s12, %s363_s13  ;;  %p369_p4 = scmp.lt.s32.totalorder %s363_s13, %s363_s13 }
  0x2a   :  { %v443_v12 = vsub.f32 %v41_v9, %v47_v10  ;;  %104 = vrot.lane.b32.xlu0 %v438_v8, %s395_s6  ;;  %v45_v13 = vld [vmem:[#allocation2 + $0x28] sm:$0xff]  ;;  %v58_v15 = vmul.f32 0.15915494, %v438_v8  ;;  %v456_v24 = vsub.f32 %v44_v17, %v50_v18  ;;  %v180_v25 = vrot.slane %v438_v8, 7 }
  0x2b   :  { %v453_v22 = vsub.f32 %v45_v13, %v51_v14  ;;  %v61_v28 = vmul.f32 0.15915494, %v441_v11  ;;  %v289_v29 = vround.rtne.f32 %v60_v20  ;;  %vm183_vm0 = vcmp.lt.s32.totalorder %v448_v16, 1  ;;  %p370_p5 = por %p369_p4, %p368_p3 }
  0x2c   :  { %v59_v19 = vmul.f32 0.15915494, %v443_v12  ;;  %v287_v21 = vround.rtne.f32 %v58_v15  ;;  %v181_v26 = vrot.slane %v443_v12, 7  ;;  %v186_v33 = vsel %vm183_vm0, %v182_v27, %v180_v25 }
  0x2d   :  { %110 = vrot.lane.b32.xlu1 %v441_v11, %s395_s6  ;;  %v62_v34 = vmul.f32 0.15915494, %v456_v24  ;;  %v290_v35 = vround.rtne.f32 %v61_v28  ;;  %v72_v36 = vmul.f32 6.2831855, %v289_v29  ;;  %v220_v40 = vrot.slane %v441_v11, 7  ;;  %p371_p6 = pnand %p370_p5, %p364_p2 }
  0x2e   :  { %v288_v23 = vround.rtne.f32 %v59_v19  ;;  %106 = vrot.lane.b32.xlu0 %v443_v12, %s395_s6  ;;  %v70_v30 = vmul.f32 6.2831855, %v287_v21  ;;  %v185_v32 = vsel %vm183_vm0, %v180_v25, %v181_v26  ;;  %v184_v37 = vsel %vm183_vm0, %v181_v26, %v182_v27 }
  0x2f   :  { %v221_v41 = vrot.slane %v456_v24, 7  ;;  %v187_v42 = vsub.f32 %v186_v33, %v438_v8  ;;  %v188_v43 = vsub.f32 %v185_v32, %v443_v12  ;;  %v189_v44 = vsub.f32 %v184_v37, %v436_v4 }
  0x30   :  { %v71_v31 = vmul.f32 6.2831855, %v288_v23  ;;  %v76_v38 = vsub.f32 %v438_v8, %v70_v30  ;;  %v222_v45 = vrot.slane %v453_v22, 7  ;;  %v63_v47 = vmul.f32 0.15915494, %v453_v22 }
  0x31   :  { %114 = vrot.lane.b32.xlu1 %v453_v22, %s395_s6  ;;  %v224_v46 = vsel %vm183_vm0, %v220_v40, %v221_v41  ;;  %v291_v48 = vround.rtne.f32 %v62_v34  ;;  %v73_v49 = vmul.f32 6.2831855, %v290_v35  ;;  %v78_v50 = vsub.f32 %v436_v4, %v72_v36 }
  0x32   :  { %112 = vrot.lane.b32.xlu0 %v456_v24, %s395_s6  ;;  %v77_v39 = vsub.f32 %v443_v12, %v71_v31  ;;  %v82_v51 = vand.u32 2147483647, %v76_v38  ;;  %v223_v53 = vsel %vm183_vm0, %v221_v41, %v222_v45  ;;  %v225_v54 = vsel %vm183_vm0, %v222_v45, %v220_v40 }
  0x33   :  { %v190_v55 = vmul.f32 0.15915494, %v187_v42  ;;  %v191_v56 = vmul.f32 0.15915494, %v188_v43  ;;  %v227_v57 = vsub.f32 %v224_v46, %v456_v24  ;;  %v192_v58 = vmul.f32 0.15915494, %v189_v44 }
  0x34   :  { %v83_v52 = vand.u32 2147483647, %v77_v39  ;;  %v226_v59 = vsub.f32 %v225_v54, %v441_v11  ;;  %v228_v60 = vsub.f32 %v223_v53, %v453_v22  ;;  %v292_v61 = vround.rtne.f32 %v63_v47 }
  0x35   :  { %v74_v62 = vmul.f32 6.2831855, %v291_v48  ;;  %v79_v63 = vsub.f32 %v441_v11, %v73_v49  ;;  %v84_v0 = vand.u32 2147483647, %v78_v50  ;;  %v303_v2 = vround.rtne.f32 %v190_v55 }
  0x36   :  { %v88_v1 = vadd.f32 %v83_v52, %v82_v51  ;;  %v304_v5 = vround.rtne.f32 %v191_v56  ;;  %v229_v6 = vmul.f32 0.15915494, %v226_v59  ;;  %v230_v7 = vmul.f32 0.15915494, %v227_v57 }
  0x37   :  { %v305_v9 = vround.rtne.f32 %v192_v58  ;;  %v231_v10 = vmul.f32 0.15915494, %v228_v60  ;;  %v75_v13 = vmul.f32 6.2831855, %v292_v61  ;;  %v80_v14 = vsub.f32 %v456_v24, %v74_v62 }
  0x38   :  { %v85_v15 = vand.u32 2147483647, %v79_v63  ;;  %v89_v17 = vadd.f32 %v88_v1, %v84_v0  ;;  %v196_v18 = vmul.f32 6.2831855, %v303_v2  ;;  %v197_v19 = vmul.f32 6.2831855, %v304_v5 }
  0x39   :  { %v308_v20 = vround.rtne.f32 %v229_v6  ;;  %v309_v21 = vround.rtne.f32 %v230_v7  ;;  %v198_v23 = vmul.f32 6.2831855, %v305_v9  ;;  %v310_v25 = vround.rtne.f32 %v231_v10 }
  0x3a   :  { %v81_v26 = vsub.f32 %v453_v22, %v75_v13  ;;  %v86_v27 = vand.u32 2147483647, %v80_v14  ;;  %v90_v28 = vadd.f32 %v89_v17, %v85_v15  ;;  %v199_v29 = vsub.f32 %v187_v42, %v196_v18 }
  0x3b   :  { %v200_v30 = vsub.f32 %v188_v43, %v197_v19  ;;  %v235_v31 = vmul.f32 6.2831855, %v308_v20  ;;  %v236_v32 = vmul.f32 6.2831855, %v309_v21  ;;  %v201_v33 = vsub.f32 %v189_v44, %v198_v23 }
  0x3c   :  { %v237_v34 = vmul.f32 6.2831855, %v310_v25  ;;  %v176_v35 = vadd.s32 16, %v448_v16  ;;  %v87_v36 = vand.u32 2147483647, %v81_v26  ;;  %v91_v37 = vadd.f32 %v90_v28, %v86_v27 }
  0x3d   :  { %v202_v38 = vand.u32 2147483647, %v199_v29  ;;  %v203_v39 = vand.u32 2147483647, %v200_v30  ;;  %v238_v40 = vsub.f32 %v226_v59, %v235_v31  ;;  %v239_v41 = vsub.f32 %v227_v57, %v236_v32 }
  0x3e   :  { %v204_v45 = vand.u32 2147483647, %v201_v33  ;;  %v240_v46 = vsub.f32 %v228_v60, %v237_v34  ;;  %vm179_vm1 = vcmp.lt.s32.totalorder %v176_v35, 17  ;;  %v92_v47 = vadd.f32 %v91_v37, %v87_v36 }
  0x3f   :  { %v208_v48 = vadd.f32 %v203_v39, %v202_v38  ;;  %v241_v49 = vand.u32 2147483647, %v238_v40  ;;  %v242_v42 = vand.u32 2147483647, %v239_v41  ;;  %vm268_vm6 = vcmp.eq.s32.totalorder %v448_v16, 0 }
  0x40   :  { %v207_v43 = vsel %vm179_vm1, %v204_v45, 0.0  ;;  %v243_v50 = vand.u32 2147483647, %v240_v46 }
  0x41   :  { %v209_v44 = vadd.f32 %v208_v48, %v207_v43  ;;  %v247_v51 = vadd.f32 %v242_v42, %v241_v49 }
  0x42   :  { %v246_v52 = vsel %vm179_vm1, %v243_v50, 0.0 }
  0x43   :  { %v248_v53 = vadd.f32 %v247_v51, %v246_v52 }
  0x51   :  { %93 = vadd.xlane.f32.xlu0 %v92_v47 }
  0x55   :  { %210 = vadd.xlane.f32.xlu0 %v209_v44 }
  0x59   :  { %249 = vadd.xlane.f32.xlu0 %v248_v53 }
  0x9b   :  { %v109_v54 = vpop.permute.xlu1 %108 }
  0x9c   :  { %v119_v55 = vsub.f32 %v109_v54, %v436_v4  ;;  %v105_v56 = vpop.permute.xlu0 %104 }
  0x9d   :  { %v117_v57 = vsub.f32 %v105_v56, %v438_v8  ;;  %v501_v8 = vand.u32 127, %v102_v3 }
  0x9e   :  { %v125_v58 = vmul.f32 0.15915494, %v119_v55 }
  0x9f   :  { %v123_v59 = vmul.f32 0.15915494, %v117_v57  ;;  %v111_v60 = vpop.permute.xlu1 %110  ;;  %vm116_vm2 = vcmp.lt.s32.totalorder %v501_v8, 33  ;;  %vm261_vm3 = vcmp.eq.s32.totalorder %v501_v8, 2  ;;  %vm260_vm4 = vcmp.eq.s32.totalorder %v501_v8, 1 }
  0xa0   :  { %v297_v61 = vround.rtne.f32 %v125_v58  ;;  %v120_v62 = vsub.f32 %v111_v60, %v441_v11  ;;  %v107_v63 = vpop.permute.xlu0 %106  ;;  %vm259_vm5 = vcmp.eq.s32.totalorder %v501_v8, 0 }
  0xa1   :  { %v295_v0 = vround.rtne.f32 %v123_v59  ;;  %v118_v1 = vsub.f32 %v107_v63, %v443_v12 }
  0xa2   :  { %v126_v2 = vmul.f32 0.15915494, %v120_v62  ;;  %v137_v5 = vmul.f32 6.2831855, %v297_v61 }
  0xa3   :  { %v135_v6 = vmul.f32 6.2831855, %v295_v0  ;;  %v124_v7 = vmul.f32 0.15915494, %v118_v1  ;;  %v115_v9 = vpop.permute.xlu1 %114 }
  0xa4   :  { %v298_v10 = vround.rtne.f32 %v126_v2  ;;  %v122_v4 = vsub.f32 %v115_v9, %v453_v22  ;;  %v113_v13 = vpop.permute.xlu0 %112  ;;  %v143_v19 = vsub.f32 %v119_v55, %v137_v5 }
  0xa5   :  { %v141_v14 = vsub.f32 %v117_v57, %v135_v6  ;;  %v296_v15 = vround.rtne.f32 %v124_v7  ;;  %v121_v11 = vsub.f32 %v113_v13, %v456_v24 }
  0xa6   :  { %v138_v17 = vmul.f32 6.2831855, %v298_v10  ;;  %v128_v18 = vmul.f32 0.15915494, %v122_v4  ;;  %v149_v28 = vand.u32 2147483647, %v143_v19 }
  0xa7   :  { %v136_v12 = vmul.f32 6.2831855, %v296_v15  ;;  %v127_v20 = vmul.f32 0.15915494, %v121_v11  ;;  %v147_v21 = vand.u32 2147483647, %v141_v14 }
  0xa8   :  { %v300_v23 = vround.rtne.f32 %v128_v18  ;;  %v144_v25 = vsub.f32 %v120_v62, %v138_v17  ;;  %v155_v35 = vsel %vm116_vm2, %v149_v28, 0.0 }
  0xa9   :  { %v142_v26 = vsub.f32 %v118_v1, %v136_v12  ;;  %v299_v22 = vround.rtne.f32 %v127_v20  ;;  %v153_v30 = vsel %vm116_vm2, %v147_v21, 0.0 }
  0xaa   :  { %v140_v27 = vmul.f32 6.2831855, %v300_v23  ;;  %v150_v24 = vand.u32 2147483647, %v144_v25 }
  0xab   :  { %v148_v3 = vand.u32 2147483647, %v142_v26  ;;  %v139_v29 = vmul.f32 6.2831855, %v299_v22 }
  0xac   :  { %v146_v32 = vsub.f32 %v122_v4, %v140_v27  ;;  %v156_v38 = vsel %vm116_vm2, %v150_v24, 0.0 }
  0xad   :  { %v154_v31 = vsel %vm116_vm2, %v148_v3, 0.0  ;;  %v145_v33 = vsub.f32 %v121_v11, %v139_v29 }
  0xae   :  { %v159_v34 = vadd.f32 %v154_v31, %v153_v30  ;;  %v152_v39 = vand.u32 2147483647, %v146_v32 }
  0xaf   :  { %v151_v36 = vand.u32 2147483647, %v145_v33 }
  0xb0   :  { %v160_v37 = vadd.f32 %v159_v34, %v155_v35  ;;  %v158_v46 = vsel %vm116_vm2, %v152_v39, 0.0 }
  0xb1   :  { %v157_v41 = vsel %vm116_vm2, %v151_v36, 0.0 }
  0xb2   :  { %v161_v40 = vadd.f32 %v160_v37, %v156_v38 }
  0xb4   :  { %v162_v45 = vadd.f32 %v161_v40, %v157_v41 }
  0xb6   :  { %v163_v47 = vadd.f32 %v162_v45, %v158_v46 }
  0xb8   :  { %164 = vadd.xlane.f32.xlu1 %v163_v47 }
  0xde   :  { %v94_v48 = vpop.xlane.xlu0 %93 }
  0xdf   :  { %v95_v49 = vrot.slane %v94_v48, 4 }
  0xe1   :  { %v96_v42 = vadd.f32 %v95_v49, %v94_v48 }
  0xe2   :  { %v211_v52 = vpop.xlane.xlu0 %210 }
  0xe3   :  { %v97_v43 = vrot.slane %v96_v42, 2  ;;  %v212_v54 = vrot.slane %v211_v52, 4 }
  0xe5   :  { %v98_v50 = vadd.f32 %v97_v43, %v96_v42  ;;  %v213_v56 = vadd.f32 %v212_v54, %v211_v52 }
  0xe6   :  { %v250_v53 = vpop.xlane.xlu0 %249 }
  0xe7   :  { %v99_v44 = vrot.slane %v98_v50, 1  ;;  %v251_v55 = vrot.slane %v250_v53, 4  ;;  %v214_v58 = vrot.slane %v213_v56, 2 }
  0xe9   :  { %v100_v51 = vadd.f32 %v99_v44, %v98_v50  ;;  %v252_v57 = vadd.f32 %v251_v55, %v250_v53  ;;  %v215_v63 = vadd.f32 %v214_v58, %v213_v56 }
  0xeb   :  { %293 = vpush %v100_v51  ;;  %v253_v60 = vrot.slane %v252_v57, 2  ;;  %v216_v5 = vrot.slane %v215_v63, 1 }
  0xed   :  { %v254_v0 = vadd.f32 %v253_v60, %v252_v57  ;;  %v217_v10 = vadd.f32 %v216_v5, %v215_v63 }
  0xef   :  { %v255_v7 = vrot.slane %v254_v0, 1 }
  0xf1   :  { %v256_v4 = vadd.f32 %v255_v7, %v254_v0 }
 0x11c   :  { %s294_s1 = spop %293 }
 0x11d   :  { %v266_v11 = vstv %s294_s1 }
 0x145   :  { %v165_v59 = vpop.xlane.xlu1 %164 }
 0x146   :  { %v166_v61 = vrot.slane %v165_v59, 4 }
 0x148   :  { %v167_v62 = vadd.f32 %v166_v61, %v165_v59 }
 0x14a   :  { %v168_v1 = vrot.slane %v167_v62, 2 }
 0x14c   :  { %v169_v2 = vadd.f32 %v168_v1, %v167_v62 }
 0x14e   :  { %v170_v6 = vrot.slane %v169_v2, 1 }
 0x150   :  { %v171_v9 = vadd.f32 %v170_v6, %v169_v2 }
 0x152   :  { %301 = vpush %v171_v9 }
 0x153   :  { %306 = vpush %v217_v10 }
 0x154   :  { %311 = vpush %v256_v4 }
 0x183   :  { %s302_s7 = spop %301 }
 0x184   :  { %s307_s8 = spop %306  ;;  %v264_v14 = vstv %s302_s7 }
 0x185   :  { %s312_s9 = spop %311 }
 0x186   :  { %s258_s10 = sadd.f32 %s312_s9, %s307_s8 }
 0x188   :  { %v262_v13 = vstv %s258_s10 }
 0x189   :  { %v263_v15 = vsel %vm261_vm3, %v262_v13, 0.0 }
 0x18a   :  { %v265_v17 = vsel %vm260_vm4, %v264_v14, %v263_v15 }
 0x18b   :  { %v267_v18 = vsel %vm259_vm5, %v266_v11, %v265_v17 }
 0x18c   :  { %v269_v19 = vsel %vm268_vm6, %v267_v18, 0.0 }
 0x18d   :  { %270 = vst [vmem:[#allocation7] sm:$0xff] %v269_v19 }
 0x18e   :  { %374 = shalt.err (!%p371_p6)
}
 0x18f   :  { %s375_s16 = scalar_lea.hbm %s535_s2, 128 }
 0x190   :  { %p376_p7 = scmp.ne.s32.totalorder %s535_s2, %s375_s16  ;;  %p379_p8 = scmp.lt.u32.totalorder %s375_s16, %s535_s2 }
 0x192   :  { %p381_p9 = pnand %p379_p8, %p376_p7 }
 0x194   :  { %384 = shalt.err (!%p381_p9)
}
 0x195   :  { %280 = dma.vmem_to_hbm [thread:$0]  %s278_s12, 128, %s535_s2, [#allocation4]  }
 0x196   :  { %389 = dma.done.wait [#allocation4], 128  }
 0x197   :  { %390 = vsyncadd [#allocation4], 4294967168 }
 0x198   :  { %284 = vsyncpa [#allocation3], 1 }
 0x199   :  { %285 = vsyncpa [#allocation6], 1 }
 0x19a   :  { %286 = vsyncpa [#allocation4], 1 }

</bundles_post_ra>
